<compile_context>
chip_gen: v5e
topology: v5e:2x2
jax: 0.10.0
libtpu: 0.0.40
codegen_flags: <defaults>
</compile_context>

<pallas_src>
import numpy as np
import jax
import jax.numpy as jnp
from jax.experimental import pallas as pl
from jax.experimental.pallas import tpu as pltpu

_MAX_DMA_RING = 8  # max manual copies kept in flight per grid step


def _pairs_for_mode(nch, ch_mode):
    if ch_mode == 'M':
        return [(0, j) for j in range(1, nch)]
    # 'MM': same ordering as the PyTorch loops: (0,1),(0,2),...,(nch-2,nch-1)
    return [(i, j) for i in range(nch - 1) for j in range(i + 1, nch)]


def _make_batch_kernel(pairs, nsem):
    npair = len(pairs)
    n_cp = 2 * npair

    def kernel(x_ref, out_hbm, sems):
        # x_ref  : (1, nch, L) f32 VMEM block (this batch's channels, pipelined in)
        # out_hbm: (nb*npair*2, L) f32 raw HBM output (written only via DMA)
        # sems   : (nsem,) DMA semaphores (ring)
        b = pl.program_id(0)
        base = b * n_cp
        descs = []
        idx = 0
        for p, (ci, cj) in enumerate(pairs):          # static unroll
            for k, ch in enumerate((ci, cj)):         # k=0: ref ch, k=1: paired ch
                slot = idx % nsem
                if idx >= nsem:                       # keep <= nsem copies in flight
                    descs[idx - nsem].wait()
                d = pltpu.make_async_copy(
                    x_ref.at[0, pl.ds(ch, 1), :],                   # (1, L) VMEM row
                    out_hbm.at[pl.ds(base + 2 * p + k, 1), :],      # (1, L) HBM row
                    sems.at[slot])
                d.start()
                descs.append(d)
                idx += 1
        for d in descs[max(0, n_cp - nsem):]:
            d.wait()

    return kernel


def add_ch_to_batch(data, ch_mode):
    """Pallas implementation of AddChToBatch.forward.

    data: complex (nb, nch, *trailing)
    returns complex64 (nb * npair, 2, *trailing), or the input unchanged for '1'.
    """
    assert ch_mode in ('MM', 'M', '1'), 'Unrecognized microphone channel mode~'
    data = jnp.asarray(data)
    if ch_mode == '1':
        # deepcopy(data): JAX arrays are immutable, a pass-through is the copy.
        return data

    nb, nch = int(data.shape[0]), int(data.shape[1])
    trailing = tuple(int(d) for d in data.shape[2:])
    pairs = _pairs_for_mode(nch, ch_mode)
    npair = len(pairs)
    n_rows = nb * npair

    L = int(np.prod(trailing, dtype=np.int64)) * 2     # interleaved f32 per channel row
    if n_rows == 0 or L == 0:
        return jnp.zeros((n_rows, 2) + trailing, jnp.complex64)

    # complex64 -> interleaved (re, im) float32, reshaped to per-batch channel slabs.
    x = data.astype(jnp.complex64)
    x_ri = jnp.stack([jnp.real(x), jnp.imag(x)], axis=-1)
    x3 = x_ri.reshape(nb, nch, L)

    nsem = max(1, min(_MAX_DMA_RING, 2 * npair))
    kernel = _make_batch_kernel(pairs, nsem)

    out_rows = pl.pallas_call(
        kernel,
        out_shape=jax.ShapeDtypeStruct((n_rows * 2, L), jnp.float32),
        grid=(nb,),
        in_specs=[pl.BlockSpec((1, nch, L), lambda b: (b, 0, 0))],
        out_specs=pl.BlockSpec(memory_space=pl.ANY),
        scratch_shapes=[pltpu.SemaphoreType.DMA((nsem,))],
        compiler_params=pltpu.CompilerParams(
            dimension_semantics=("parallel",)),
    )(x3)

    # Rows are already in final memory order: (pair_row, slot) interleaved.
    out = out_rows.reshape((n_rows, 2) + trailing + (2,))
    return (out[..., 0] + 1j * out[..., 1]).astype(jnp.complex64)


def add_ch_to_batch_ref(data, ch_mode):
    """NumPy reference reproducing the PyTorch module exactly."""
    data = np.asarray(data)
    nb, nch = data.shape[0], data.shape[1]
    if ch_mode == 'M':
        out = np.zeros((nb * (nch - 1), 2) + data.shape[2:], np.complex64)
        for b in range(nb):
            st, ed = b * (nch - 1), (b + 1) * (nch - 1)
            out[st:ed, 0, ...] = data[b, 0:1, ...]
            out[st:ed, 1, ...] = data[b, 1:nch, ...]
    elif ch_mode == 'MM':
        P = nch * (nch - 1) // 2
        out = np.zeros((nb * P, 2) + data.shape[2:], np.complex64)
        for b in range(nb):
            for ci in range(nch - 1):
                st = b * P + (2 * nch - 2 - ci + 1) * ci // 2
                ed = b * P + (2 * nch - 2 - ci) * (ci + 1) // 2
                out[st:ed, 0, ...] = data[b, ci:ci + 1, ...]
                out[st:ed, 1, ...] = data[b, ci + 1:, ...]
    else:
        out = data.copy()
    return out


if __name__ == "__main__":
    # Small STFT-like shapes consistent with the module: (nb, nch, nf, nt) complex64.
    nb, nch, nf, nt = 2, 4, 16, 8
    key = jax.random.PRNGKey(0)
    k1, k2 = jax.random.split(key)
    re = jax.random.normal(k1, (nb, nch, nf, nt), dtype=jnp.float32)
    im = jax.random.normal(k2, (nb, nch, nf, nt), dtype=jnp.float32)
    data = (re + 1j * im).astype(jnp.complex64)

    for mode in ('MM', 'M', '1'):
        out = jax.block_until_ready(add_ch_to_batch(data, mode))
        ref = add_ch_to_batch_ref(np.asarray(data), mode)
        assert out.shape == ref.shape, (mode, out.shape, ref.shape)
        # pure data movement -> bit-exact
        np.testing.assert_allclose(np.asarray(out), ref, rtol=0, atol=0)

    print("KERNEL_OK")
</pallas_src>

<mosaic_0001>
module attributes {stable_mosaic.version = 11 : i64} {
  func.func @kernel(%arg0: i32, %arg1: memref<1x4x256xf32, #tpu.memory_space<vmem>>, %arg2: memref<24x256xf32, #tpu.memory_space<any>>, %arg3: memref<8x!tpu.dma_semaphore, #tpu.memory_space<semaphore_mem>>) attributes {dimension_semantics = [#tpu.dimension_semantics<parallel>], iteration_bounds = array<i64: 2>, scalar_prefetch = 0 : i64, scratch_operands = 1 : i64, tpu.core_type = #tpu.core_type<tc>, window_params = [{transform_indices = @transform_0, window_bounds = array<i64: 1, 4, 256>}, {}]} {
    %c12_i32 = arith.constant 12 : i32
    %0 = arith.muli %arg0, %c12_i32 : i32
    %c0_i32 = arith.constant 0 : i32
    %1 = arith.addi %0, %c0_i32 : i32
    %c0_i32_0 = arith.constant 0 : i32
    %2 = arith.addi %1, %c0_i32_0 : i32
    %c0_i32_1 = arith.constant 0 : i32
    %c0_i32_2 = arith.constant 0 : i32
    %c0_i32_3 = arith.constant 0 : i32
    %c0_i32_4 = arith.constant 0 : i32
    %3 = tpu.memref_slice %arg1[%c0_i32_1, %c0_i32_3, %c0_i32_4] : memref<1x4x256xf32, #tpu.memory_space<vmem>> -> memref<1x1x256xf32, #tpu.memory_space<vmem>>
    %4 = tpu.memref_squeeze %3 : memref<1x1x256xf32, #tpu.memory_space<vmem>> -> memref<1x256xf32, #tpu.memory_space<vmem>>
    %c0_i32_5 = arith.constant 0 : i32
    %5 = tpu.memref_slice %arg2[%2, %c0_i32_5] : memref<24x256xf32, #tpu.memory_space<any>> -> memref<1x256xf32, #tpu.memory_space<any>>
    %6 = tpu.memref_slice %arg3[%c0_i32_2] : memref<8x!tpu.dma_semaphore, #tpu.memory_space<semaphore_mem>> -> memref<1x!tpu.dma_semaphore, #tpu.memory_space<semaphore_mem>>
    %7 = tpu.memref_squeeze %6 : memref<1x!tpu.dma_semaphore, #tpu.memory_space<semaphore_mem>> -> memref<!tpu.dma_semaphore, #tpu.memory_space<semaphore_mem>>
    tpu.enqueue_dma source(%4 : memref<1x256xf32, #tpu.memory_space<vmem>>) target(%5 : memref<1x256xf32, #tpu.memory_space<any>>) target_semaphore(%7 : memref<!tpu.dma_semaphore, #tpu.memory_space<semaphore_mem>>)
    %c0_i32_6 = arith.constant 0 : i32
    %8 = arith.addi %0, %c0_i32_6 : i32
    %c1_i32 = arith.constant 1 : i32
    %9 = arith.addi %8, %c1_i32 : i32
    %c0_i32_7 = arith.constant 0 : i32
    %c1_i32_8 = arith.constant 1 : i32
    %c1_i32_9 = arith.constant 1 : i32
    %c0_i32_10 = arith.constant 0 : i32
    %10 = tpu.memref_slice %arg1[%c0_i32_7, %c1_i32_9, %c0_i32_10] : memref<1x4x256xf32, #tpu.memory_space<vmem>> -> memref<1x1x256xf32, #tpu.memory_space<vmem>>
    %11 = tpu.memref_squeeze %10 : memref<1x1x256xf32, #tpu.memory_space<vmem>> -> memref<1x256xf32, #tpu.memory_space<vmem>>
    %c0_i32_11 = arith.constant 0 : i32
    %12 = tpu.memref_slice %arg2[%9, %c0_i32_11] : memref<24x256xf32, #tpu.memory_space<any>> -> memref<1x256xf32, #tpu.memory_space<any>>
    %13 = tpu.memref_slice %arg3[%c1_i32_8] : memref<8x!tpu.dma_semaphore, #tpu.memory_space<semaphore_mem>> -> memref<1x!tpu.dma_semaphore, #tpu.memory_space<semaphore_mem>>
    %14 = tpu.memref_squeeze %13 : memref<1x!tpu.dma_semaphore, #tpu.memory_space<semaphore_mem>> -> memref<!tpu.dma_semaphore, #tpu.memory_space<semaphore_mem>>
    tpu.enqueue_dma source(%11 : memref<1x256xf32, #tpu.memory_space<vmem>>) target(%12 : memref<1x256xf32, #tpu.memory_space<any>>) target_semaphore(%14 : memref<!tpu.dma_semaphore, #tpu.memory_space<semaphore_mem>>)
    %c2_i32 = arith.constant 2 : i32
    %15 = arith.addi %0, %c2_i32 : i32
    %c0_i32_12 = arith.constant 0 : i32
    %16 = arith.addi %15, %c0_i32_12 : i32
    %c0_i32_13 = arith.constant 0 : i32
    %c2_i32_14 = arith.constant 2 : i32
    %c0_i32_15 = arith.constant 0 : i32
    %c0_i32_16 = arith.constant 0 : i32
    %17 = tpu.memref_slice %arg1[%c0_i32_13, %c0_i32_15, %c0_i32_16] : memref<1x4x256xf32, #tpu.memory_space<vmem>> -> memref<1x1x256xf32, #tpu.memory_space<vmem>>
    %18 = tpu.memref_squeeze %17 : memref<1x1x256xf32, #tpu.memory_space<vmem>> -> memref<1x256xf32, #tpu.memory_space<vmem>>
    %c0_i32_17 = arith.constant 0 : i32
    %19 = tpu.memref_slice %arg2[%16, %c0_i32_17] : memref<24x256xf32, #tpu.memory_space<any>> -> memref<1x256xf32, #tpu.memory_space<any>>
    %20 = tpu.memref_slice %arg3[%c2_i32_14] : memref<8x!tpu.dma_semaphore, #tpu.memory_space<semaphore_mem>> -> memref<1x!tpu.dma_semaphore, #tpu.memory_space<semaphore_mem>>
    %21 = tpu.memref_squeeze %20 : memref<1x!tpu.dma_semaphore, #tpu.memory_space<semaphore_mem>> -> memref<!tpu.dma_semaphore, #tpu.memory_space<semaphore_mem>>
    tpu.enqueue_dma source(%18 : memref<1x256xf32, #tpu.memory_space<vmem>>) target(%19 : memref<1x256xf32, #tpu.memory_space<any>>) target_semaphore(%21 : memref<!tpu.dma_semaphore, #tpu.memory_space<semaphore_mem>>)
    %c2_i32_18 = arith.constant 2 : i32
    %22 = arith.addi %0, %c2_i32_18 : i32
    %c1_i32_19 = arith.constant 1 : i32
    %23 = arith.addi %22, %c1_i32_19 : i32
    %c0_i32_20 = arith.constant 0 : i32
    %c3_i32 = arith.constant 3 : i32
    %c2_i32_21 = arith.constant 2 : i32
    %c0_i32_22 = arith.constant 0 : i32
    %24 = tpu.memref_slice %arg1[%c0_i32_20, %c2_i32_21, %c0_i32_22] : memref<1x4x256xf32, #tpu.memory_space<vmem>> -> memref<1x1x256xf32, #tpu.memory_space<vmem>>
    %25 = tpu.memref_squeeze %24 : memref<1x1x256xf32, #tpu.memory_space<vmem>> -> memref<1x256xf32, #tpu.memory_space<vmem>>
    %c0_i32_23 = arith.constant 0 : i32
    %26 = tpu.memref_slice %arg2[%23, %c0_i32_23] : memref<24x256xf32, #tpu.memory_space<any>> -> memref<1x256xf32, #tpu.memory_space<any>>
    %27 = tpu.memref_slice %arg3[%c3_i32] : memref<8x!tpu.dma_semaphore, #tpu.memory_space<semaphore_mem>> -> memref<1x!tpu.dma_semaphore, #tpu.memory_space<semaphore_mem>>
    %28 = tpu.memref_squeeze %27 : memref<1x!tpu.dma_semaphore, #tpu.memory_space<semaphore_mem>> -> memref<!tpu.dma_semaphore, #tpu.memory_space<semaphore_mem>>
    tpu.enqueue_dma source(%25 : memref<1x256xf32, #tpu.memory_space<vmem>>) target(%26 : memref<1x256xf32, #tpu.memory_space<any>>) target_semaphore(%28 : memref<!tpu.dma_semaphore, #tpu.memory_space<semaphore_mem>>)
    %c4_i32 = arith.constant 4 : i32
    %29 = arith.addi %0, %c4_i32 : i32
    %c0_i32_24 = arith.constant 0 : i32
    %30 = arith.addi %29, %c0_i32_24 : i32
    %c0_i32_25 = arith.constant 0 : i32
    %c4_i32_26 = arith.constant 4 : i32
    %c0_i32_27 = arith.constant 0 : i32
    %c0_i32_28 = arith.constant 0 : i32
    %31 = tpu.memref_slice %arg1[%c0_i32_25, %c0_i32_27, %c0_i32_28] : memref<1x4x256xf32, #tpu.memory_space<vmem>> -> memref<1x1x256xf32, #tpu.memory_space<vmem>>
    %32 = tpu.memref_squeeze %31 : memref<1x1x256xf32, #tpu.memory_space<vmem>> -> memref<1x256xf32, #tpu.memory_space<vmem>>
    %c0_i32_29 = arith.constant 0 : i32
    %33 = tpu.memref_slice %arg2[%30, %c0_i32_29] : memref<24x256xf32, #tpu.memory_space<any>> -> memref<1x256xf32, #tpu.memory_space<any>>
    %34 = tpu.memref_slice %arg3[%c4_i32_26] : memref<8x!tpu.dma_semaphore, #tpu.memory_space<semaphore_mem>> -> memref<1x!tpu.dma_semaphore, #tpu.memory_space<semaphore_mem>>
    %35 = tpu.memref_squeeze %34 : memref<1x!tpu.dma_semaphore, #tpu.memory_space<semaphore_mem>> -> memref<!tpu.dma_semaphore, #tpu.memory_space<semaphore_mem>>
    tpu.enqueue_dma source(%32 : memref<1x256xf32, #tpu.memory_space<vmem>>) target(%33 : memref<1x256xf32, #tpu.memory_space<any>>) target_semaphore(%35 : memref<!tpu.dma_semaphore, #tpu.memory_space<semaphore_mem>>)
    %c4_i32_30 = arith.constant 4 : i32
    %36 = arith.addi %0, %c4_i32_30 : i32
    %c1_i32_31 = arith.constant 1 : i32
    %37 = arith.addi %36, %c1_i32_31 : i32
    %c0_i32_32 = arith.constant 0 : i32
    %c5_i32 = arith.constant 5 : i32
    %c3_i32_33 = arith.constant 3 : i32
    %c0_i32_34 = arith.constant 0 : i32
    %38 = tpu.memref_slice %arg1[%c0_i32_32, %c3_i32_33, %c0_i32_34] : memref<1x4x256xf32, #tpu.memory_space<vmem>> -> memref<1x1x256xf32, #tpu.memory_space<vmem>>
    %39 = tpu.memref_squeeze %38 : memref<1x1x256xf32, #tpu.memory_space<vmem>> -> memref<1x256xf32, #tpu.memory_space<vmem>>
    %c0_i32_35 = arith.constant 0 : i32
    %40 = tpu.memref_slice %arg2[%37, %c0_i32_35] : memref<24x256xf32, #tpu.memory_space<any>> -> memref<1x256xf32, #tpu.memory_space<any>>
    %41 = tpu.memref_slice %arg3[%c5_i32] : memref<8x!tpu.dma_semaphore, #tpu.memory_space<semaphore_mem>> -> memref<1x!tpu.dma_semaphore, #tpu.memory_space<semaphore_mem>>
    %42 = tpu.memref_squeeze %41 : memref<1x!tpu.dma_semaphore, #tpu.memory_space<semaphore_mem>> -> memref<!tpu.dma_semaphore, #tpu.memory_space<semaphore_mem>>
    tpu.enqueue_dma source(%39 : memref<1x256xf32, #tpu.memory_space<vmem>>) target(%40 : memref<1x256xf32, #tpu.memory_space<any>>) target_semaphore(%42 : memref<!tpu.dma_semaphore, #tpu.memory_space<semaphore_mem>>)
    %c6_i32 = arith.constant 6 : i32
    %43 = arith.addi %0, %c6_i32 : i32
    %c0_i32_36 = arith.constant 0 : i32
    %44 = arith.addi %43, %c0_i32_36 : i32
    %c0_i32_37 = arith.constant 0 : i32
    %c6_i32_38 = arith.constant 6 : i32
    %c1_i32_39 = arith.constant 1 : i32
    %c0_i32_40 = arith.constant 0 : i32
    %45 = tpu.memref_slice %arg1[%c0_i32_37, %c1_i32_39, %c0_i32_40] : memref<1x4x256xf32, #tpu.memory_space<vmem>> -> memref<1x1x256xf32, #tpu.memory_space<vmem>>
    %46 = tpu.memref_squeeze %45 : memref<1x1x256xf32, #tpu.memory_space<vmem>> -> memref<1x256xf32, #tpu.memory_space<vmem>>
    %c0_i32_41 = arith.constant 0 : i32
    %47 = tpu.memref_slice %arg2[%44, %c0_i32_41] : memref<24x256xf32, #tpu.memory_space<any>> -> memref<1x256xf32, #tpu.memory_space<any>>
    %48 = tpu.memref_slice %arg3[%c6_i32_38] : memref<8x!tpu.dma_semaphore, #tpu.memory_space<semaphore_mem>> -> memref<1x!tpu.dma_semaphore, #tpu.memory_space<semaphore_mem>>
    %49 = tpu.memref_squeeze %48 : memref<1x!tpu.dma_semaphore, #tpu.memory_space<semaphore_mem>> -> memref<!tpu.dma_semaphore, #tpu.memory_space<semaphore_mem>>
    tpu.enqueue_dma source(%46 : memref<1x256xf32, #tpu.memory_space<vmem>>) target(%47 : memref<1x256xf32, #tpu.memory_space<any>>) target_semaphore(%49 : memref<!tpu.dma_semaphore, #tpu.memory_space<semaphore_mem>>)
    %c6_i32_42 = arith.constant 6 : i32
    %50 = arith.addi %0, %c6_i32_42 : i32
    %c1_i32_43 = arith.constant 1 : i32
    %51 = arith.addi %50, %c1_i32_43 : i32
    %c0_i32_44 = arith.constant 0 : i32
    %c7_i32 = arith.constant 7 : i32
    %c2_i32_45 = arith.constant 2 : i32
    %c0_i32_46 = arith.constant 0 : i32
    %52 = tpu.memref_slice %arg1[%c0_i32_44, %c2_i32_45, %c0_i32_46] : memref<1x4x256xf32, #tpu.memory_space<vmem>> -> memref<1x1x256xf32, #tpu.memory_space<vmem>>
    %53 = tpu.memref_squeeze %52 : memref<1x1x256xf32, #tpu.memory_space<vmem>> -> memref<1x256xf32, #tpu.memory_space<vmem>>
    %c0_i32_47 = arith.constant 0 : i32
    %54 = tpu.memref_slice %arg2[%51, %c0_i32_47] : memref<24x256xf32, #tpu.memory_space<any>> -> memref<1x256xf32, #tpu.memory_space<any>>
    %55 = tpu.memref_slice %arg3[%c7_i32] : memref<8x!tpu.dma_semaphore, #tpu.memory_space<semaphore_mem>> -> memref<1x!tpu.dma_semaphore, #tpu.memory_space<semaphore_mem>>
    %56 = tpu.memref_squeeze %55 : memref<1x!tpu.dma_semaphore, #tpu.memory_space<semaphore_mem>> -> memref<!tpu.dma_semaphore, #tpu.memory_space<semaphore_mem>>
    tpu.enqueue_dma source(%53 : memref<1x256xf32, #tpu.memory_space<vmem>>) target(%54 : memref<1x256xf32, #tpu.memory_space<any>>) target_semaphore(%56 : memref<!tpu.dma_semaphore, #tpu.memory_space<semaphore_mem>>)
    %c0_i32_48 = arith.constant 0 : i32
    %c0_i32_49 = arith.constant 0 : i32
    %c0_i32_50 = arith.constant 0 : i32
    %c0_i32_51 = arith.constant 0 : i32
    %57 = tpu.memref_slice %arg1[%c0_i32_48, %c0_i32_50, %c0_i32_51] : memref<1x4x256xf32, #tpu.memory_space<vmem>> -> memref<1x1x256xf32, #tpu.memory_space<vmem>>
    %58 = tpu.memref_squeeze %57 : memref<1x1x256xf32, #tpu.memory_space<vmem>> -> memref<1x256xf32, #tpu.memory_space<vmem>>
    %c0_i32_52 = arith.constant 0 : i32
    %59 = tpu.memref_slice %arg2[%2, %c0_i32_52] : memref<24x256xf32, #tpu.memory_space<any>> -> memref<1x256xf32, #tpu.memory_space<any>>
    %60 = tpu.memref_slice %arg3[%c0_i32_49] : memref<8x!tpu.dma_semaphore, #tpu.memory_space<semaphore_mem>> -> memref<1x!tpu.dma_semaphore, #tpu.memory_space<semaphore_mem>>
    %61 = tpu.memref_squeeze %60 : memref<1x!tpu.dma_semaphore, #tpu.memory_space<semaphore_mem>> -> memref<!tpu.dma_semaphore, #tpu.memory_space<semaphore_mem>>
    tpu.wait_dma2 semaphore(%61 : memref<!tpu.dma_semaphore, #tpu.memory_space<semaphore_mem>>) src(%58 : memref<1x256xf32, #tpu.memory_space<vmem>>) dst(%59 : memref<1x256xf32, #tpu.memory_space<any>>)
    %c8_i32 = arith.constant 8 : i32
    %62 = arith.addi %0, %c8_i32 : i32
    %c0_i32_53 = arith.constant 0 : i32
    %63 = arith.addi %62, %c0_i32_53 : i32
    %c0_i32_54 = arith.constant 0 : i32
    %c0_i32_55 = arith.constant 0 : i32
    %c1_i32_56 = arith.constant 1 : i32
    %c0_i32_57 = arith.constant 0 : i32
    %64 = tpu.memref_slice %arg1[%c0_i32_54, %c1_i32_56, %c0_i32_57] : memref<1x4x256xf32, #tpu.memory_space<vmem>> -> memref<1x1x256xf32, #tpu.memory_space<vmem>>
    %65 = tpu.memref_squeeze %64 : memref<1x1x256xf32, #tpu.memory_space<vmem>> -> memref<1x256xf32, #tpu.memory_space<vmem>>
    %c0_i32_58 = arith.constant 0 : i32
    %66 = tpu.memref_slice %arg2[%63, %c0_i32_58] : memref<24x256xf32, #tpu.memory_space<any>> -> memref<1x256xf32, #tpu.memory_space<any>>
    %67 = tpu.memref_slice %arg3[%c0_i32_55] : memref<8x!tpu.dma_semaphore, #tpu.memory_space<semaphore_mem>> -> memref<1x!tpu.dma_semaphore, #tpu.memory_space<semaphore_mem>>
    %68 = tpu.memref_squeeze %67 : memref<1x!tpu.dma_semaphore, #tpu.memory_space<semaphore_mem>> -> memref<!tpu.dma_semaphore, #tpu.memory_space<semaphore_mem>>
    tpu.enqueue_dma source(%65 : memref<1x256xf32, #tpu.memory_space<vmem>>) target(%66 : memref<1x256xf32, #tpu.memory_space<any>>) target_semaphore(%68 : memref<!tpu.dma_semaphore, #tpu.memory_space<semaphore_mem>>)
    %c0_i32_59 = arith.constant 0 : i32
    %c1_i32_60 = arith.constant 1 : i32
    %c1_i32_61 = arith.constant 1 : i32
    %c0_i32_62 = arith.constant 0 : i32
    %69 = tpu.memref_slice %arg1[%c0_i32_59, %c1_i32_61, %c0_i32_62] : memref<1x4x256xf32, #tpu.memory_space<vmem>> -> memref<1x1x256xf32, #tpu.memory_space<vmem>>
    %70 = tpu.memref_squeeze %69 : memref<1x1x256xf32, #tpu.memory_space<vmem>> -> memref<1x256xf32, #tpu.memory_space<vmem>>
    %c0_i32_63 = arith.constant 0 : i32
    %71 = tpu.memref_slice %arg2[%9, %c0_i32_63] : memref<24x256xf32, #tpu.memory_space<any>> -> memref<1x256xf32, #tpu.memory_space<any>>
    %72 = tpu.memref_slice %arg3[%c1_i32_60] : memref<8x!tpu.dma_semaphore, #tpu.memory_space<semaphore_mem>> -> memref<1x!tpu.dma_semaphore, #tpu.memory_space<semaphore_mem>>
    %73 = tpu.memref_squeeze %72 : memref<1x!tpu.dma_semaphore, #tpu.memory_space<semaphore_mem>> -> memref<!tpu.dma_semaphore, #tpu.memory_space<semaphore_mem>>
    tpu.wait_dma2 semaphore(%73 : memref<!tpu.dma_semaphore, #tpu.memory_space<semaphore_mem>>) src(%70 : memref<1x256xf32, #tpu.memory_space<vmem>>) dst(%71 : memref<1x256xf32, #tpu.memory_space<any>>)
    %c8_i32_64 = arith.constant 8 : i32
    %74 = arith.addi %0, %c8_i32_64 : i32
    %c1_i32_65 = arith.constant 1 : i32
    %75 = arith.addi %74, %c1_i32_65 : i32
    %c0_i32_66 = arith.constant 0 : i32
    %c1_i32_67 = arith.constant 1 : i32
    %c3_i32_68 = arith.constant 3 : i32
    %c0_i32_69 = arith.constant 0 : i32
    %76 = tpu.memref_slice %arg1[%c0_i32_66, %c3_i32_68, %c0_i32_69] : memref<1x4x256xf32, #tpu.memory_space<vmem>> -> memref<1x1x256xf32, #tpu.memory_space<vmem>>
    %77 = tpu.memref_squeeze %76 : memref<1x1x256xf32, #tpu.memory_space<vmem>> -> memref<1x256xf32, #tpu.memory_space<vmem>>
    %c0_i32_70 = arith.constant 0 : i32
    %78 = tpu.memref_slice %arg2[%75, %c0_i32_70] : memref<24x256xf32, #tpu.memory_space<any>> -> memref<1x256xf32, #tpu.memory_space<any>>
    %79 = tpu.memref_slice %arg3[%c1_i32_67] : memref<8x!tpu.dma_semaphore, #tpu.memory_space<semaphore_mem>> -> memref<1x!tpu.dma_semaphore, #tpu.memory_space<semaphore_mem>>
    %80 = tpu.memref_squeeze %79 : memref<1x!tpu.dma_semaphore, #tpu.memory_space<semaphore_mem>> -> memref<!tpu.dma_semaphore, #tpu.memory_space<semaphore_mem>>
    tpu.enqueue_dma source(%77 : memref<1x256xf32, #tpu.memory_space<vmem>>) target(%78 : memref<1x256xf32, #tpu.memory_space<any>>) target_semaphore(%80 : memref<!tpu.dma_semaphore, #tpu.memory_space<semaphore_mem>>)
    %c0_i32_71 = arith.constant 0 : i32
    %c2_i32_72 = arith.constant 2 : i32
    %c0_i32_73 = arith.constant 0 : i32
    %c0_i32_74 = arith.constant 0 : i32
    %81 = tpu.memref_slice %arg1[%c0_i32_71, %c0_i32_73, %c0_i32_74] : memref<1x4x256xf32, #tpu.memory_space<vmem>> -> memref<1x1x256xf32, #tpu.memory_space<vmem>>
    %82 = tpu.memref_squeeze %81 : memref<1x1x256xf32, #tpu.memory_space<vmem>> -> memref<1x256xf32, #tpu.memory_space<vmem>>
    %c0_i32_75 = arith.constant 0 : i32
    %83 = tpu.memref_slice %arg2[%16, %c0_i32_75] : memref<24x256xf32, #tpu.memory_space<any>> -> memref<1x256xf32, #tpu.memory_space<any>>
    %84 = tpu.memref_slice %arg3[%c2_i32_72] : memref<8x!tpu.dma_semaphore, #tpu.memory_space<semaphore_mem>> -> memref<1x!tpu.dma_semaphore, #tpu.memory_space<semaphore_mem>>
    %85 = tpu.memref_squeeze %84 : memref<1x!tpu.dma_semaphore, #tpu.memory_space<semaphore_mem>> -> memref<!tpu.dma_semaphore, #tpu.memory_space<semaphore_mem>>
    tpu.wait_dma2 semaphore(%85 : memref<!tpu.dma_semaphore, #tpu.memory_space<semaphore_mem>>) src(%82 : memref<1x256xf32, #tpu.memory_space<vmem>>) dst(%83 : memref<1x256xf32, #tpu.memory_space<any>>)
    %c10_i32 = arith.constant 10 : i32
    %86 = arith.addi %0, %c10_i32 : i32
    %c0_i32_76 = arith.constant 0 : i32
    %87 = arith.addi %86, %c0_i32_76 : i32
    %c0_i32_77 = arith.constant 0 : i32
    %c2_i32_78 = arith.constant 2 : i32
    %c2_i32_79 = arith.constant 2 : i32
    %c0_i32_80 = arith.constant 0 : i32
    %88 = tpu.memref_slice %arg1[%c0_i32_77, %c2_i32_79, %c0_i32_80] : memref<1x4x256xf32, #tpu.memory_space<vmem>> -> memref<1x1x256xf32, #tpu.memory_space<vmem>>
    %89 = tpu.memref_squeeze %88 : memref<1x1x256xf32, #tpu.memory_space<vmem>> -> memref<1x256xf32, #tpu.memory_space<vmem>>
    %c0_i32_81 = arith.constant 0 : i32
    %90 = tpu.memref_slice %arg2[%87, %c0_i32_81] : memref<24x256xf32, #tpu.memory_space<any>> -> memref<1x256xf32, #tpu.memory_space<any>>
    %91 = tpu.memref_slice %arg3[%c2_i32_78] : memref<8x!tpu.dma_semaphore, #tpu.memory_space<semaphore_mem>> -> memref<1x!tpu.dma_semaphore, #tpu.memory_space<semaphore_mem>>
    %92 = tpu.memref_squeeze %91 : memref<1x!tpu.dma_semaphore, #tpu.memory_space<semaphore_mem>> -> memref<!tpu.dma_semaphore, #tpu.memory_space<semaphore_mem>>
    tpu.enqueue_dma source(%89 : memref<1x256xf32, #tpu.memory_space<vmem>>) target(%90 : memref<1x256xf32, #tpu.memory_space<any>>) target_semaphore(%92 : memref<!tpu.dma_semaphore, #tpu.memory_space<semaphore_mem>>)
    %c0_i32_82 = arith.constant 0 : i32
    %c3_i32_83 = arith.constant 3 : i32
    %c2_i32_84 = arith.constant 2 : i32
    %c0_i32_85 = arith.constant 0 : i32
    %93 = tpu.memref_slice %arg1[%c0_i32_82, %c2_i32_84, %c0_i32_85] : memref<1x4x256xf32, #tpu.memory_space<vmem>> -> memref<1x1x256xf32, #tpu.memory_space<vmem>>
    %94 = tpu.memref_squeeze %93 : memref<1x1x256xf32, #tpu.memory_space<vmem>> -> memref<1x256xf32, #tpu.memory_space<vmem>>
    %c0_i32_86 = arith.constant 0 : i32
    %95 = tpu.memref_slice %arg2[%23, %c0_i32_86] : memref<24x256xf32, #tpu.memory_space<any>> -> memref<1x256xf32, #tpu.memory_space<any>>
    %96 = tpu.memref_slice %arg3[%c3_i32_83] : memref<8x!tpu.dma_semaphore, #tpu.memory_space<semaphore_mem>> -> memref<1x!tpu.dma_semaphore, #tpu.memory_space<semaphore_mem>>
    %97 = tpu.memref_squeeze %96 : memref<1x!tpu.dma_semaphore, #tpu.memory_space<semaphore_mem>> -> memref<!tpu.dma_semaphore, #tpu.memory_space<semaphore_mem>>
    tpu.wait_dma2 semaphore(%97 : memref<!tpu.dma_semaphore, #tpu.memory_space<semaphore_mem>>) src(%94 : memref<1x256xf32, #tpu.memory_space<vmem>>) dst(%95 : memref<1x256xf32, #tpu.memory_space<any>>)
    %c10_i32_87 = arith.constant 10 : i32
    %98 = arith.addi %0, %c10_i32_87 : i32
    %c1_i32_88 = arith.constant 1 : i32
    %99 = arith.addi %98, %c1_i32_88 : i32
    %c0_i32_89 = arith.constant 0 : i32
    %c3_i32_90 = arith.constant 3 : i32
    %c3_i32_91 = arith.constant 3 : i32
    %c0_i32_92 = arith.constant 0 : i32
    %100 = tpu.memref_slice %arg1[%c0_i32_89, %c3_i32_91, %c0_i32_92] : memref<1x4x256xf32, #tpu.memory_space<vmem>> -> memref<1x1x256xf32, #tpu.memory_space<vmem>>
    %101 = tpu.memref_squeeze %100 : memref<1x1x256xf32, #tpu.memory_space<vmem>> -> memref<1x256xf32, #tpu.memory_space<vmem>>
    %c0_i32_93 = arith.constant 0 : i32
    %102 = tpu.memref_slice %arg2[%99, %c0_i32_93] : memref<24x256xf32, #tpu.memory_space<any>> -> memref<1x256xf32, #tpu.memory_space<any>>
    %103 = tpu.memref_slice %arg3[%c3_i32_90] : memref<8x!tpu.dma_semaphore, #tpu.memory_space<semaphore_mem>> -> memref<1x!tpu.dma_semaphore, #tpu.memory_space<semaphore_mem>>
    %104 = tpu.memref_squeeze %103 : memref<1x!tpu.dma_semaphore, #tpu.memory_space<semaphore_mem>> -> memref<!tpu.dma_semaphore, #tpu.memory_space<semaphore_mem>>
    tpu.enqueue_dma source(%101 : memref<1x256xf32, #tpu.memory_space<vmem>>) target(%102 : memref<1x256xf32, #tpu.memory_space<any>>) target_semaphore(%104 : memref<!tpu.dma_semaphore, #tpu.memory_space<semaphore_mem>>)
    %c0_i32_94 = arith.constant 0 : i32
    %c4_i32_95 = arith.constant 4 : i32
    %c0_i32_96 = arith.constant 0 : i32
    %c0_i32_97 = arith.constant 0 : i32
    %105 = tpu.memref_slice %arg1[%c0_i32_94, %c0_i32_96, %c0_i32_97] : memref<1x4x256xf32, #tpu.memory_space<vmem>> -> memref<1x1x256xf32, #tpu.memory_space<vmem>>
    %106 = tpu.memref_squeeze %105 : memref<1x1x256xf32, #tpu.memory_space<vmem>> -> memref<1x256xf32, #tpu.memory_space<vmem>>
    %c0_i32_98 = arith.constant 0 : i32
    %107 = tpu.memref_slice %arg2[%30, %c0_i32_98] : memref<24x256xf32, #tpu.memory_space<any>> -> memref<1x256xf32, #tpu.memory_space<any>>
    %108 = tpu.memref_slice %arg3[%c4_i32_95] : memref<8x!tpu.dma_semaphore, #tpu.memory_space<semaphore_mem>> -> memref<1x!tpu.dma_semaphore, #tpu.memory_space<semaphore_mem>>
    %109 = tpu.memref_squeeze %108 : memref<1x!tpu.dma_semaphore, #tpu.memory_space<semaphore_mem>> -> memref<!tpu.dma_semaphore, #tpu.memory_space<semaphore_mem>>
    tpu.wait_dma2 semaphore(%109 : memref<!tpu.dma_semaphore, #tpu.memory_space<semaphore_mem>>) src(%106 : memref<1x256xf32, #tpu.memory_space<vmem>>) dst(%107 : memref<1x256xf32, #tpu.memory_space<any>>)
    %c0_i32_99 = arith.constant 0 : i32
    %c5_i32_100 = arith.constant 5 : i32
    %c3_i32_101 = arith.constant 3 : i32
    %c0_i32_102 = arith.constant 0 : i32
    %110 = tpu.memref_slice %arg1[%c0_i32_99, %c3_i32_101, %c0_i32_102] : memref<1x4x256xf32, #tpu.memory_space<vmem>> -> memref<1x1x256xf32, #tpu.memory_space<vmem>>
    %111 = tpu.memref_squeeze %110 : memref<1x1x256xf32, #tpu.memory_space<vmem>> -> memref<1x256xf32, #tpu.memory_space<vmem>>
    %c0_i32_103 = arith.constant 0 : i32
    %112 = tpu.memref_slice %arg2[%37, %c0_i32_103] : memref<24x256xf32, #tpu.memory_space<any>> -> memref<1x256xf32, #tpu.memory_space<any>>
    %113 = tpu.memref_slice %arg3[%c5_i32_100] : memref<8x!tpu.dma_semaphore, #tpu.memory_space<semaphore_mem>> -> memref<1x!tpu.dma_semaphore, #tpu.memory_space<semaphore_mem>>
    %114 = tpu.memref_squeeze %113 : memref<1x!tpu.dma_semaphore, #tpu.memory_space<semaphore_mem>> -> memref<!tpu.dma_semaphore, #tpu.memory_space<semaphore_mem>>
    tpu.wait_dma2 semaphore(%114 : memref<!tpu.dma_semaphore, #tpu.memory_space<semaphore_mem>>) src(%111 : memref<1x256xf32, #tpu.memory_space<vmem>>) dst(%112 : memref<1x256xf32, #tpu.memory_space<any>>)
    %c0_i32_104 = arith.constant 0 : i32
    %c6_i32_105 = arith.constant 6 : i32
    %c1_i32_106 = arith.constant 1 : i32
    %c0_i32_107 = arith.constant 0 : i32
    %115 = tpu.memref_slice %arg1[%c0_i32_104, %c1_i32_106, %c0_i32_107] : memref<1x4x256xf32, #tpu.memory_space<vmem>> -> memref<1x1x256xf32, #tpu.memory_space<vmem>>
    %116 = tpu.memref_squeeze %115 : memref<1x1x256xf32, #tpu.memory_space<vmem>> -> memref<1x256xf32, #tpu.memory_space<vmem>>
    %c0_i32_108 = arith.constant 0 : i32
    %117 = tpu.memref_slice %arg2[%44, %c0_i32_108] : memref<24x256xf32, #tpu.memory_space<any>> -> memref<1x256xf32, #tpu.memory_space<any>>
    %118 = tpu.memref_slice %arg3[%c6_i32_105] : memref<8x!tpu.dma_semaphore, #tpu.memory_space<semaphore_mem>> -> memref<1x!tpu.dma_semaphore, #tpu.memory_space<semaphore_mem>>
    %119 = tpu.memref_squeeze %118 : memref<1x!tpu.dma_semaphore, #tpu.memory_space<semaphore_mem>> -> memref<!tpu.dma_semaphore, #tpu.memory_space<semaphore_mem>>
    tpu.wait_dma2 semaphore(%119 : memref<!tpu.dma_semaphore, #tpu.memory_space<semaphore_mem>>) src(%116 : memref<1x256xf32, #tpu.memory_space<vmem>>) dst(%117 : memref<1x256xf32, #tpu.memory_space<any>>)
    %c0_i32_109 = arith.constant 0 : i32
    %c7_i32_110 = arith.constant 7 : i32
    %c2_i32_111 = arith.constant 2 : i32
    %c0_i32_112 = arith.constant 0 : i32
    %120 = tpu.memref_slice %arg1[%c0_i32_109, %c2_i32_111, %c0_i32_112] : memref<1x4x256xf32, #tpu.memory_space<vmem>> -> memref<1x1x256xf32, #tpu.memory_space<vmem>>
    %121 = tpu.memref_squeeze %120 : memref<1x1x256xf32, #tpu.memory_space<vmem>> -> memref<1x256xf32, #tpu.memory_space<vmem>>
    %c0_i32_113 = arith.constant 0 : i32
    %122 = tpu.memref_slice %arg2[%51, %c0_i32_113] : memref<24x256xf32, #tpu.memory_space<any>> -> memref<1x256xf32, #tpu.memory_space<any>>
    %123 = tpu.memref_slice %arg3[%c7_i32_110] : memref<8x!tpu.dma_semaphore, #tpu.memory_space<semaphore_mem>> -> memref<1x!tpu.dma_semaphore, #tpu.memory_space<semaphore_mem>>
    %124 = tpu.memref_squeeze %123 : memref<1x!tpu.dma_semaphore, #tpu.memory_space<semaphore_mem>> -> memref<!tpu.dma_semaphore, #tpu.memory_space<semaphore_mem>>
    tpu.wait_dma2 semaphore(%124 : memref<!tpu.dma_semaphore, #tpu.memory_space<semaphore_mem>>) src(%121 : memref<1x256xf32, #tpu.memory_space<vmem>>) dst(%122 : memref<1x256xf32, #tpu.memory_space<any>>)
    %c0_i32_114 = arith.constant 0 : i32
    %c0_i32_115 = arith.constant 0 : i32
    %c1_i32_116 = arith.constant 1 : i32
    %c0_i32_117 = arith.constant 0 : i32
    %125 = tpu.memref_slice %arg1[%c0_i32_114, %c1_i32_116, %c0_i32_117] : memref<1x4x256xf32, #tpu.memory_space<vmem>> -> memref<1x1x256xf32, #tpu.memory_space<vmem>>
    %126 = tpu.memref_squeeze %125 : memref<1x1x256xf32, #tpu.memory_space<vmem>> -> memref<1x256xf32, #tpu.memory_space<vmem>>
    %c0_i32_118 = arith.constant 0 : i32
    %127 = tpu.memref_slice %arg2[%63, %c0_i32_118] : memref<24x256xf32, #tpu.memory_space<any>> -> memref<1x256xf32, #tpu.memory_space<any>>
    %128 = tpu.memref_slice %arg3[%c0_i32_115] : memref<8x!tpu.dma_semaphore, #tpu.memory_space<semaphore_mem>> -> memref<1x!tpu.dma_semaphore, #tpu.memory_space<semaphore_mem>>
    %129 = tpu.memref_squeeze %128 : memref<1x!tpu.dma_semaphore, #tpu.memory_space<semaphore_mem>> -> memref<!tpu.dma_semaphore, #tpu.memory_space<semaphore_mem>>
    tpu.wait_dma2 semaphore(%129 : memref<!tpu.dma_semaphore, #tpu.memory_space<semaphore_mem>>) src(%126 : memref<1x256xf32, #tpu.memory_space<vmem>>) dst(%127 : memref<1x256xf32, #tpu.memory_space<any>>)
    %c0_i32_119 = arith.constant 0 : i32
    %c1_i32_120 = arith.constant 1 : i32
    %c3_i32_121 = arith.constant 3 : i32
    %c0_i32_122 = arith.constant 0 : i32
    %130 = tpu.memref_slice %arg1[%c0_i32_119, %c3_i32_121, %c0_i32_122] : memref<1x4x256xf32, #tpu.memory_space<vmem>> -> memref<1x1x256xf32, #tpu.memory_space<vmem>>
    %131 = tpu.memref_squeeze %130 : memref<1x1x256xf32, #tpu.memory_space<vmem>> -> memref<1x256xf32, #tpu.memory_space<vmem>>
    %c0_i32_123 = arith.constant 0 : i32
    %132 = tpu.memref_slice %arg2[%75, %c0_i32_123] : memref<24x256xf32, #tpu.memory_space<any>> -> memref<1x256xf32, #tpu.memory_space<any>>
    %133 = tpu.memref_slice %arg3[%c1_i32_120] : memref<8x!tpu.dma_semaphore, #tpu.memory_space<semaphore_mem>> -> memref<1x!tpu.dma_semaphore, #tpu.memory_space<semaphore_mem>>
    %134 = tpu.memref_squeeze %133 : memref<1x!tpu.dma_semaphore, #tpu.memory_space<semaphore_mem>> -> memref<!tpu.dma_semaphore, #tpu.memory_space<semaphore_mem>>
    tpu.wait_dma2 semaphore(%134 : memref<!tpu.dma_semaphore, #tpu.memory_space<semaphore_mem>>) src(%131 : memref<1x256xf32, #tpu.memory_space<vmem>>) dst(%132 : memref<1x256xf32, #tpu.memory_space<any>>)
    %c0_i32_124 = arith.constant 0 : i32
    %c2_i32_125 = arith.constant 2 : i32
    %c2_i32_126 = arith.constant 2 : i32
    %c0_i32_127 = arith.constant 0 : i32
    %135 = tpu.memref_slice %arg1[%c0_i32_124, %c2_i32_126, %c0_i32_127] : memref<1x4x256xf32, #tpu.memory_space<vmem>> -> memref<1x1x256xf32, #tpu.memory_space<vmem>>
    %136 = tpu.memref_squeeze %135 : memref<1x1x256xf32, #tpu.memory_space<vmem>> -> memref<1x256xf32, #tpu.memory_space<vmem>>
    %c0_i32_128 = arith.constant 0 : i32
    %137 = tpu.memref_slice %arg2[%87, %c0_i32_128] : memref<24x256xf32, #tpu.memory_space<any>> -> memref<1x256xf32, #tpu.memory_space<any>>
    %138 = tpu.memref_slice %arg3[%c2_i32_125] : memref<8x!tpu.dma_semaphore, #tpu.memory_space<semaphore_mem>> -> memref<1x!tpu.dma_semaphore, #tpu.memory_space<semaphore_mem>>
    %139 = tpu.memref_squeeze %138 : memref<1x!tpu.dma_semaphore, #tpu.memory_space<semaphore_mem>> -> memref<!tpu.dma_semaphore, #tpu.memory_space<semaphore_mem>>
    tpu.wait_dma2 semaphore(%139 : memref<!tpu.dma_semaphore, #tpu.memory_space<semaphore_mem>>) src(%136 : memref<1x256xf32, #tpu.memory_space<vmem>>) dst(%137 : memref<1x256xf32, #tpu.memory_space<any>>)
    %c0_i32_129 = arith.constant 0 : i32
    %c3_i32_130 = arith.constant 3 : i32
    %c3_i32_131 = arith.constant 3 : i32
    %c0_i32_132 = arith.constant 0 : i32
    %140 = tpu.memref_slice %arg1[%c0_i32_129, %c3_i32_131, %c0_i32_132] : memref<1x4x256xf32, #tpu.memory_space<vmem>> -> memref<1x1x256xf32, #tpu.memory_space<vmem>>
    %141 = tpu.memref_squeeze %140 : memref<1x1x256xf32, #tpu.memory_space<vmem>> -> memref<1x256xf32, #tpu.memory_space<vmem>>
    %c0_i32_133 = arith.constant 0 : i32
    %142 = tpu.memref_slice %arg2[%99, %c0_i32_133] : memref<24x256xf32, #tpu.memory_space<any>> -> memref<1x256xf32, #tpu.memory_space<any>>
    %143 = tpu.memref_slice %arg3[%c3_i32_130] : memref<8x!tpu.dma_semaphore, #tpu.memory_space<semaphore_mem>> -> memref<1x!tpu.dma_semaphore, #tpu.memory_space<semaphore_mem>>
    %144 = tpu.memref_squeeze %143 : memref<1x!tpu.dma_semaphore, #tpu.memory_space<semaphore_mem>> -> memref<!tpu.dma_semaphore, #tpu.memory_space<semaphore_mem>>
    tpu.wait_dma2 semaphore(%144 : memref<!tpu.dma_semaphore, #tpu.memory_space<semaphore_mem>>) src(%141 : memref<1x256xf32, #tpu.memory_space<vmem>>) dst(%142 : memref<1x256xf32, #tpu.memory_space<any>>)
    return
  }
  func.func @transform_0(%arg0: i32) -> (i32, i32, i32) {
    %c0_i32 = arith.constant 0 : i32
    %c0_i32_0 = arith.constant 0 : i32
    %c0_i32_1 = arith.constant 0 : i32
    return %arg0, %c0_i32, %c0_i32_0 : i32, i32, i32
  }
}

</mosaic_0001>

<bundles_post_ra>
// kernel: tpu_custom_call.1
= control target key start
LH: loop header
LB: loop body
LE: loop exit
PB: predicated region body
PF: predicated region fallthrough
CT: control target
= control target key end

     0   :  { %s1124_s0 = inlined_call_operand.hbm [shape: f32[2,4,256], index: 0, kind: input, shape index: {}]   ;;  %s1125_s1 = inlined_call_operand.hbm [shape: f32[24,256], index: 1, kind: output, shape index: {}]  }
   0x1   :  { %1126 = sst [smem:[#allocation30_spill]] %s1124_s0 }
   0x2   :  { %6 = vsyncpa [#allocation4], 0 }
   0x3   :  { %8 = vsyncpa [#allocation4 + $0x1], 0  ;;  %s873_s6 = smov 0   ;;  %s875_s7 = smov 0  }
   0x4   :  { %s877_s8 = smov 0   ;;  %s879_s9 = smov 0  }
   0x5 LB: > { %s409_s10 = sadd.s32 4294967295, %s858_s9   ;;  %s893_s11 = sadd.s32 1, %s858_s9   ;;  %s858_s9 = sphi %s879_s9, %s1134_s9   ;;  %s854_s8 = sphi %s877_s8, %s1133_s8   ;;  %s850_s7 = sphi %s875_s7, %s1132_s7   ;;  %s846_s6 = sphi %s873_s6, %s1131_s6  }
   0x6   : > { %s17_s12 = ssub.s32 %s858_s9, %s893_s11  ;;  %s20_s13 = sadd.s32 1, %s854_s8 }
   0x7   : > { %p18_p0 = scmp.eq.s32.totalorder %s17_s12, 0  ;;  %p26_p1 = scmp.ne.s32.totalorder %s854_s8, %s850_s7 }
   0x8   : > { %p27_p2 = scmp.eq.s32.totalorder %s858_s9, 0  ;;  %p33_p3 = scmp.ne.s32.totalorder %s850_s7, %s846_s6 }
   0x9   : > { %s903_s14 = scalar_select %p18_p0, %s854_s8, %s20_s13  }
   0xa   : > { %p905_p4 = por %p27_p2, %p26_p1  ;;  %p34_p5 = scmp.eq.s32.totalorder %s409_s10, 0 }
   0xb   : > { %p446_p6 = scmp.lt.s32.totalorder %s858_s9, 2  ;;  %s48_s17 = sand.u32 1, %s854_s8  }
   0xc   : > { %p912_p7 = por %p34_p5, %p33_p3  ;;  %s413_s18 = sshll.u32 %s48_s17, 3 }
   0xd   : > { %s439_s19 = sshll.u32 %s858_s9, 3  ;;  %s1129_s0 = sld [smem:[#allocation30_spill]] }
   0xe   : > { %s52_s23 = scalar_lea.vmem [#allocation3], %s413_s18  ;;  %p923_p8 = pnand %p446_p6, %p905_p4 }
   0xf   : > { %s61_s24 = sshll.u32 %s52_s23, 4  ;;  %s49_s27 = scalar_lea.sflag [#allocation4], %s48_s17  ;;  %s62_s24 = int_to_ptr.vmem [resolvable:$true] %s61_s24 }
  0x10   : > { %p486_p10 = pneg %p923_p8 }
  0x13   : > { %s57_s22 = scalar_lea.hbm %s1129_s0, %s439_s19  ;;  %s489_s3 = scalar_lea.hbm %s1129_s0, 16 }
  0x14   : > { %s59_s25 = sshll.u32 %s57_s22, 4  ;;  %s60_s25 = int_to_ptr.hbm [resolvable:$true] %s59_s25 }
  0x15   : > { %s482_s28 = sshra.s32 %s60_s25, 4  ;;  %s483_s28 = int_to_ptr.hbm [resolvable:$true] %s482_s28 }
  0x16   : > { %s484_s29 = scalar_lea.hbm %s483_s28, 8  ;;  %p490_p13 = scmp.lt.s32.totalorder %s483_s28, %s1129_s0 }
  0x17   : > { %p485_p9 = scmp.ne.s32.totalorder %s483_s28, %s484_s29  ;;  %p491_p0 = scmp.lt.s32.totalorder %s489_s3, %s484_s29 }
  0x19   : > { %p487_p11 = pnand %p486_p10, %p485_p9  ;;  %p492_p1 = por %p491_p0, %p490_p13 }
  0x1b   : > { %p488_p12 = pneg %p487_p11 }
  0x1d   : > { %p493_p2 = pnand %p492_p1, %p488_p12 }
  0x1f   : > { %496 = shalt.err (!%p493_p2)
}
  0x20   : > { %445 = dma.hbm_to_vmem [thread:$0]  (!%p923_p8), %s60_s25, 128, %s62_s24, %s49_s27  }
  0x21   : > { %p417_p3 = scmp.lt.s32.totalorder %s858_s9, 1 }
  0x22   : > { %s70_s6 = sand.u32 (!%p417_p3), 1, %s850_s7  }
  0x23   : > { %68 = sbr.rel (%p417_p3) target bundleno = 240 (0xf0), region = 24  ;;  %s418_s12 = sshll.u32 (!%p417_p3), %s70_s6, 3 }
  0x24   : > { %s71_s13 = scalar_lea.sflag (!%p417_p3), [#allocation4], %s70_s6  ;;  %s939_s15 = scalar_lea.vmem (!%p417_p3), [#allocation3], %s418_s12 }
  0x28   : > { %817 = dma.done.wait (%p912_p7), %s71_s13, 128  }
  0x29   : > { %819 = vsyncadd (%p912_p7), %s71_s13, 4294967168  ;;  %s947_s17 = smul.u32 12, %s409_s10  ;;  %s93_s18 = sshll.u32 %s939_s15, 4  ;;  %s950_s18 = int_to_ptr.vmem [resolvable:$true] %s93_s18 }
  0x2a   : > { %s102_s26 = scalar_lea.vmem %s939_s15, 1 [#allocation3]  ;;  %s962_s2 = scalar_lea.hbm %s1125_s1, 48 }
  0x2b   : > { %s88_s19 = sshrl.u32 %s947_s17, 3  ;;  %s89_s20 = sand.u32 7, %s947_s17  }
  0x2c   : > { %s419_s21 = sshll.u32 %s88_s19, 4  ;;  %s101_s25 = sadd.s32 1, %s947_s17 }
  0x2d   : > { %s91_s22 = sadd.s32 %s419_s21, %s89_s20  ;;  %s103_s10 = sshrl.u32 %s101_s25, 3 }
  0x2e   : > { %s92_s16 = scalar_lea.hbm %s1125_s1, %s91_s22 }
  0x2f   : > { %s95_s9 = sshll.u32 %s92_s16, 4  ;;  %s96_s9 = int_to_ptr.hbm [resolvable:$true] %s95_s9 }
  0x30   : > { %s524_s27 = sshra.s32 %s96_s9, 4  ;;  %s525_s27 = int_to_ptr.hbm [resolvable:$true] %s524_s27 }
  0x31   : > { %s526_s28 = scalar_lea.hbm %s525_s27, 2  ;;  %p529_p5 = scmp.lt.s32.totalorder %s525_s27, %s1125_s1 }
  0x32   : > { %p527_p4 = scmp.ne.s32.totalorder %s525_s27, %s526_s28  ;;  %p530_p6 = scmp.lt.s32.totalorder %s962_s2, %s526_s28 }
  0x34   : > { %p531_p7 = por %p530_p6, %p529_p5 }
  0x36   : > { %p532_p8 = pnand %p531_p7, %p527_p4 }
  0x38   : > { %535 = shalt.err (!%p532_p8)  }
  0x39   : > { %s860_s5 = smov 64   ;;  %s861_s6 = smov 128  }
  0x3a   : > { %s862_s12 = smov 1   ;;  %s104_s13 = sand.u32 7, %s101_s25  }
  0x3b   : > { %100 = dma.vmem_to_hbm [thread:$0]  %s950_s18, 32, %s96_s9, [#allocation2], %s860_s5, %s861_s6, %s862_s12 }
  0x3c   : > { %s420_s19 = sshll.u32 %s103_s10, 4  ;;  %s109_s21 = sshll.u32 %s102_s26, 4  ;;  %s975_s21 = int_to_ptr.vmem [resolvable:$true] %s109_s21 }
  0x3d   : > { %s106_s20 = sadd.s32 %s420_s19, %s104_s13  ;;  %s117_s27 = sadd.s32 2, %s947_s17 }
  0x3e   : > { %s107_s24 = scalar_lea.hbm %s1125_s1, %s106_s20  ;;  %s118_s28 = sshrl.u32 %s117_s27, 3 }
  0x3f   : > { %s111_s16 = sshll.u32 %s107_s24, 4  ;;  %s112_s16 = int_to_ptr.hbm [resolvable:$true] %s111_s16 }
  0x40   : > { %s548_s29 = sshra.s32 %s112_s16, 4  ;;  %s549_s29 = int_to_ptr.hbm [resolvable:$true] %s548_s29 }
  0x41   : > { %s550_s30 = scalar_lea.hbm %s549_s29, 2  ;;  %p553_p10 = scmp.lt.s32.totalorder %s549_s29, %s1125_s1 }
  0x42   : > { %p551_p9 = scmp.ne.s32.totalorder %s549_s29, %s550_s30  ;;  %p554_p11 = scmp.lt.s32.totalorder %s962_s2, %s550_s30 }
  0x44   : > { %p555_p12 = por %p554_p11, %p553_p10 }
  0x46   : > { %p556_p13 = pnand %p555_p12, %p551_p9 }
  0x48   : > { %559 = shalt.err (!%p556_p13)  }
  0x49   : > { %116 = dma.vmem_to_hbm [thread:$0]  %s975_s21, 32, %s112_s16, [#allocation2 + $0x1], %s860_s5, %s861_s6, %s862_s12 }
  0x4a   : > { %s119_s25 = sand.u32 7, %s117_s27   ;;  %s421_s26 = sshll.u32 %s118_s28, 4 }
  0x4b   : > { %s121_s10 = sadd.s32 %s421_s26, %s119_s25  ;;  %s132_s4 = sadd.s32 3, %s947_s17 }
  0x4c   : > { %s122_s20 = scalar_lea.hbm %s1125_s1, %s121_s10  ;;  %s133_s22 = scalar_lea.vmem %s939_s15, 2 [#allocation3] }
  0x4d   : > { %s126_s23 = sshll.u32 %s122_s20, 4  ;;  %s134_s24 = sshrl.u32 %s132_s4, 3  ;;  %s127_s23 = int_to_ptr.hbm [resolvable:$true] %s126_s23 }
  0x4e   : > { %s135_s29 = sand.u32 7, %s132_s4   ;;  %s572_s30 = sshra.s32 %s127_s23, 4  ;;  %s573_s30 = int_to_ptr.hbm [resolvable:$true] %s572_s30 }
  0x4f   : > { %s574_s9 = scalar_lea.hbm %s573_s30, 2  ;;  %p577_p1 = scmp.lt.s32.totalorder %s573_s30, %s1125_s1 }
  0x50   : > { %p575_p0 = scmp.ne.s32.totalorder %s573_s30, %s574_s9  ;;  %p578_p2 = scmp.lt.s32.totalorder %s962_s2, %s574_s9 }
  0x52   : > { %p579_p3 = por %p578_p2, %p577_p1 }
  0x54   : > { %p580_p4 = pnand %p579_p3, %p575_p0 }
  0x56   : > { %583 = shalt.err (!%p580_p4)  }
  0x57   : > { %131 = dma.vmem_to_hbm [thread:$0]  %s950_s18, 32, %s127_s23, [#allocation2 + $0x2], %s860_s5, %s861_s6, %s862_s12 }
  0x58   : > { %s422_s27 = sshll.u32 %s134_s24, 4  ;;  %s140_s28 = sshll.u32 %s133_s22, 4  ;;  %s999_s28 = int_to_ptr.vmem [resolvable:$true] %s140_s28 }
  0x59   : > { %s137_s25 = sadd.s32 %s422_s27, %s135_s29  ;;  %s148_s13 = sadd.s32 4, %s947_s17 }
  0x5a   : > { %s138_s4 = scalar_lea.hbm %s1125_s1, %s137_s25  ;;  %s149_s20 = sshrl.u32 %s148_s13, 3 }
  0x5b   : > { %s142_s19 = sshll.u32 %s138_s4, 4  ;;  %s150_s30 = sand.u32 7, %s148_s13   ;;  %s143_s19 = int_to_ptr.hbm [resolvable:$true] %s142_s19 }
  0x5c   : > { %s596_s9 = sshra.s32 %s143_s19, 4  ;;  %s597_s9 = int_to_ptr.hbm [resolvable:$true] %s596_s9 }
  0x5d   : > { %s598_s3 = scalar_lea.hbm %s597_s9, 2  ;;  %p601_p6 = scmp.lt.s32.totalorder %s597_s9, %s1125_s1 }
  0x5e   : > { %p599_p5 = scmp.ne.s32.totalorder %s597_s9, %s598_s3  ;;  %p602_p7 = scmp.lt.s32.totalorder %s962_s2, %s598_s3 }
  0x60   : > { %p603_p8 = por %p602_p7, %p601_p6 }
  0x62   : > { %p604_p9 = pnand %p603_p8, %p599_p5 }
  0x64   : > { %607 = shalt.err (!%p604_p9)  }
  0x65   : > { %147 = dma.vmem_to_hbm [thread:$0]  %s999_s28, 32, %s143_s19, [#allocation2 + $0x3], %s860_s5, %s861_s6, %s862_s12 }
  0x66   : > { %s423_s22 = sshll.u32 %s149_s20, 4  ;;  %s163_s24 = sadd.s32 5, %s947_s17 }
  0x67   : > { %s152_s29 = sadd.s32 %s423_s22, %s150_s30  ;;  %s164_s27 = scalar_lea.vmem %s939_s15, 3 [#allocation3] }
  0x68   : > { %s153_s10 = scalar_lea.hbm %s1125_s1, %s152_s29  ;;  %s165_s4 = sshrl.u32 %s163_s24, 3 }
  0x69   : > { %s157_s13 = sshll.u32 %s153_s10, 4  ;;  %s166_s9 = sand.u32 7, %s163_s24   ;;  %s158_s13 = int_to_ptr.hbm [resolvable:$true] %s157_s13 }
  0x6a   : > { %s424_s3 = sshll.u32 %s165_s4, 4  ;;  %s620_s23 = sshra.s32 %s158_s13, 4  ;;  %s621_s23 = int_to_ptr.hbm [resolvable:$true] %s620_s23 }
  0x6b   : > { %s622_s16 = scalar_lea.hbm %s621_s23, 2  ;;  %p625_p11 = scmp.lt.s32.totalorder %s621_s23, %s1125_s1 }
  0x6c   : > { %p623_p10 = scmp.ne.s32.totalorder %s621_s23, %s622_s16  ;;  %p626_p12 = scmp.lt.s32.totalorder %s962_s2, %s622_s16 }
  0x6e   : > { %p627_p13 = por %p626_p12, %p625_p11 }
  0x70   : > { %p628_p0 = pnand %p627_p13, %p623_p10 }
  0x72   : > { %631 = shalt.err (!%p628_p0)  }
  0x73   : > { %162 = dma.vmem_to_hbm [thread:$0]  %s950_s18, 32, %s158_s13, [#allocation2 + $0x4], %s860_s5, %s861_s6, %s862_s12 }
  0x74   : > { %s168_s15 = sadd.s32 %s424_s3, %s166_s9  ;;  %s171_s20 = sshll.u32 %s164_s27, 4  ;;  %s1029_s20 = int_to_ptr.vmem [resolvable:$true] %s171_s20 }
  0x75   : > { %s169_s24 = scalar_lea.hbm %s1125_s1, %s168_s15  ;;  %s179_s29 = sadd.s32 6, %s947_s17 }
  0x76   : > { %s173_s0 = sshll.u32 %s169_s24, 4  ;;  %s180_s25 = sshrl.u32 %s179_s29, 3  ;;  %s174_s0 = int_to_ptr.hbm [resolvable:$true] %s173_s0 }
  0x77   : > { %s644_s26 = sshra.s32 %s174_s0, 4  ;;  %s645_s26 = int_to_ptr.hbm [resolvable:$true] %s644_s26 }
  0x78   : > { %s646_s10 = scalar_lea.hbm %s645_s26, 2  ;;  %p649_p2 = scmp.lt.s32.totalorder %s645_s26, %s1125_s1 }
  0x79   : > { %p647_p1 = scmp.ne.s32.totalorder %s645_s26, %s646_s10  ;;  %p650_p3 = scmp.lt.s32.totalorder %s962_s2, %s646_s10 }
  0x7b   : > { %p651_p4 = por %p650_p3, %p649_p2 }
  0x7d   : > { %p652_p5 = pnand %p651_p4, %p647_p1 }
  0x7f   : > { %655 = shalt.err (!%p652_p5)  }
  0x80   : > { %178 = dma.vmem_to_hbm [thread:$0]  %s1029_s20, 32, %s174_s0, [#allocation2 + $0x5], %s860_s5, %s861_s6, %s862_s12 }
  0x81   : > { %s181_s18 = sand.u32 7, %s179_s29   ;;  %s425_s27 = sshll.u32 %s180_s25, 4 }
  0x82   : > { %s183_s13 = sadd.s32 %s425_s27, %s181_s18  ;;  %s194_s9 = sadd.s32 7, %s947_s17 }
  0x83   : > { %s184_s19 = scalar_lea.hbm %s1125_s1, %s183_s13  ;;  %s195_s15 = sshrl.u32 %s194_s9, 3 }
  0x84   : > { %s188_s30 = sshll.u32 %s184_s19, 4  ;;  %s196_s22 = sand.u32 7, %s194_s9   ;;  %s189_s30 = int_to_ptr.hbm [resolvable:$true] %s188_s30 }
  0x85   : > { %s426_s24 = sshll.u32 %s195_s15, 4  ;;  %s668_s26 = sshra.s32 %s189_s30, 4  ;;  %s669_s26 = int_to_ptr.hbm [resolvable:$true] %s668_s26 }
  0x86   : > { %s670_s10 = scalar_lea.hbm %s669_s26, 2  ;;  %p673_p7 = scmp.lt.s32.totalorder %s669_s26, %s1125_s1 }
  0x87   : > { %p671_p6 = scmp.ne.s32.totalorder %s669_s26, %s670_s10  ;;  %p674_p8 = scmp.lt.s32.totalorder %s962_s2, %s670_s10 }
  0x89   : > { %p675_p9 = por %p674_p8, %p673_p7 }
  0x8b   : > { %p676_p10 = pnand %p675_p9, %p671_p6 }
  0x8d   : > { %679 = shalt.err (!%p676_p10)  }
  0x8e   : > { %193 = dma.vmem_to_hbm [thread:$0]  %s975_s21, 32, %s189_s30, [#allocation2 + $0x6], %s860_s5, %s861_s6, %s862_s12 }
  0x8f   : > { %s198_s29 = sadd.s32 %s426_s24, %s196_s22 }
  0x90   : > { %s199_s18 = scalar_lea.hbm %s1125_s1, %s198_s29 }
  0x91   : > { %s203_s27 = sshll.u32 %s199_s18, 4  ;;  %s204_s27 = int_to_ptr.hbm [resolvable:$true] %s203_s27 }
  0x92   : > { %s692_s13 = sshra.s32 %s204_s27, 4  ;;  %s693_s13 = int_to_ptr.hbm [resolvable:$true] %s692_s13 }
  0x93   : > { %s694_s9 = scalar_lea.hbm %s693_s13, 2  ;;  %p697_p12 = scmp.lt.s32.totalorder %s693_s13, %s1125_s1 }
  0x94   : > { %p695_p11 = scmp.ne.s32.totalorder %s693_s13, %s694_s9  ;;  %p698_p13 = scmp.lt.s32.totalorder %s962_s2, %s694_s9 }
  0x96   : > { %p699_p0 = por %p698_p13, %p697_p12 }
  0x98   : > { %p700_p1 = pnand %p699_p0, %p695_p11 }
  0x9a   : > { %703 = shalt.err (!%p700_p1)  }
  0x9b   : > { %208 = dma.vmem_to_hbm [thread:$0]  %s999_s28, 32, %s204_s27, [#allocation2 + $0x7], %s860_s5, %s861_s6, %s862_s12 }
  0x9c   : > { %820 = dma.done.wait [#allocation2], 32 }
  0x9d   : > { %821 = vsyncadd [#allocation2], 4294967264  ;;  %s212_s19 = sadd.s32 8, %s947_s17 }
  0x9e   : > { %s213_s15 = sshrl.u32 %s212_s19, 3  ;;  %s214_s30 = sand.u32 7, %s212_s19  }
  0x9f   : > { %s427_s22 = sshll.u32 %s213_s15, 4 }
  0xa0   : > { %s216_s24 = sadd.s32 %s427_s22, %s214_s30 }
  0xa1   : > { %s217_s4 = scalar_lea.hbm %s1125_s1, %s216_s24 }
  0xa2   : > { %s220_s0 = sshll.u32 %s217_s4, 4  ;;  %s221_s0 = int_to_ptr.hbm [resolvable:$true] %s220_s0 }
  0xa3   : > { %s716_s29 = sshra.s32 %s221_s0, 4  ;;  %s717_s29 = int_to_ptr.hbm [resolvable:$true] %s716_s29 }
  0xa4   : > { %s718_s25 = scalar_lea.hbm %s717_s29, 2  ;;  %p721_p3 = scmp.lt.s32.totalorder %s717_s29, %s1125_s1 }
  0xa5   : > { %p719_p2 = scmp.ne.s32.totalorder %s717_s29, %s718_s25  ;;  %p722_p4 = scmp.lt.s32.totalorder %s962_s2, %s718_s25 }
  0xa7   : > { %p723_p5 = por %p722_p4, %p721_p3 }
  0xa9   : > { %p724_p6 = pnand %p723_p5, %p719_p2 }
  0xab   : > { %727 = shalt.err (!%p724_p6)  }
  0xac   : > { %225 = dma.vmem_to_hbm [thread:$0]  %s975_s21, 32, %s221_s0, [#allocation2], %s860_s5, %s861_s6, %s862_s12 }
  0xad   : > { %822 = dma.done.wait [#allocation2 + $0x1], 32 }
  0xae   : > { %823 = vsyncadd [#allocation2 + $0x1], 4294967264  ;;  %s228_s27 = sadd.s32 9, %s947_s17 }
  0xaf   : > { %s229_s13 = sshrl.u32 %s228_s27, 3  ;;  %s230_s9 = sand.u32 7, %s228_s27  }
  0xb0   : > { %s428_s3 = sshll.u32 %s229_s13, 4 }
  0xb1   : > { %s232_s16 = sadd.s32 %s428_s3, %s230_s9 }
  0xb2   : > { %s233_s30 = scalar_lea.hbm %s1125_s1, %s232_s16 }
  0xb3   : > { %s236_s22 = sshll.u32 %s233_s30, 4  ;;  %s237_s22 = int_to_ptr.hbm [resolvable:$true] %s236_s22 }
  0xb4   : > { %s740_s24 = sshra.s32 %s237_s22, 4  ;;  %s741_s24 = int_to_ptr.hbm [resolvable:$true] %s740_s24 }
  0xb5   : > { %s742_s26 = scalar_lea.hbm %s741_s24, 2  ;;  %p745_p8 = scmp.lt.s32.totalorder %s741_s24, %s1125_s1 }
  0xb6   : > { %p743_p7 = scmp.ne.s32.totalorder %s741_s24, %s742_s26  ;;  %p746_p9 = scmp.lt.s32.totalorder %s962_s2, %s742_s26 }
  0xb8   : > { %p747_p10 = por %p746_p9, %p745_p8 }
  0xba   : > { %p748_p11 = pnand %p747_p10, %p743_p7 }
  0xbc   : > { %751 = shalt.err (!%p748_p11)  }
  0xbd   : > { %241 = dma.vmem_to_hbm [thread:$0]  %s1029_s20, 32, %s237_s22, [#allocation2 + $0x1], %s860_s5, %s861_s6, %s862_s12 }
  0xbe   : > { %824 = dma.done.wait [#allocation2 + $0x2], 32 }
  0xbf   : > { %825 = vsyncadd [#allocation2 + $0x2], 4294967264  ;;  %s244_s4 = sadd.s32 10, %s947_s17 }
  0xc0   : > { %s245_s0 = sshrl.u32 %s244_s4, 3  ;;  %s246_s29 = sand.u32 7, %s244_s4  }
  0xc1   : > { %s429_s25 = sshll.u32 %s245_s0, 4 }
  0xc2   : > { %s248_s23 = sadd.s32 %s429_s25, %s246_s29 }
  0xc3   : > { %s249_s13 = scalar_lea.hbm %s1125_s1, %s248_s23 }
  0xc4   : > { %s252_s9 = sshll.u32 %s249_s13, 4  ;;  %s253_s9 = int_to_ptr.hbm [resolvable:$true] %s252_s9 }
  0xc5   : > { %s764_s3 = sshra.s32 %s253_s9, 4  ;;  %s765_s3 = int_to_ptr.hbm [resolvable:$true] %s764_s3 }
  0xc6   : > { %s766_s16 = scalar_lea.hbm %s765_s3, 2  ;;  %p769_p13 = scmp.lt.s32.totalorder %s765_s3, %s1125_s1 }
  0xc7   : > { %p767_p12 = scmp.ne.s32.totalorder %s765_s3, %s766_s16  ;;  %p770_p0 = scmp.lt.s32.totalorder %s962_s2, %s766_s16 }
  0xc9   : > { %p771_p1 = por %p770_p0, %p769_p13 }
  0xcb   : > { %p772_p2 = pnand %p771_p1, %p767_p12 }
  0xcd   : > { %775 = shalt.err (!%p772_p2)  }
  0xce   : > { %257 = dma.vmem_to_hbm [thread:$0]  %s999_s28, 32, %s253_s9, [#allocation2 + $0x2], %s860_s5, %s861_s6, %s862_s12 }
  0xcf   : > { %826 = dma.done.wait [#allocation2 + $0x3], 32 }
  0xd0   : > { %827 = vsyncadd [#allocation2 + $0x3], 4294967264  ;;  %s260_s30 = sadd.s32 11, %s947_s17 }
  0xd1   : > { %s261_s22 = sshrl.u32 %s260_s30, 3  ;;  %s262_s24 = sand.u32 7, %s260_s30  }
  0xd2   : > { %s430_s26 = sshll.u32 %s261_s22, 4 }
  0xd3   : > { %s264_s21 = sadd.s32 %s430_s26, %s262_s24 }
  0xd4   : > { %s265_s0 = scalar_lea.hbm %s1125_s1, %s264_s21 }
  0xd5   : > { %s268_s29 = sshll.u32 %s265_s0, 4  ;;  %s269_s29 = int_to_ptr.hbm [resolvable:$true] %s268_s29 }
  0xd6   : > { %s788_s25 = sshra.s32 %s269_s29, 4  ;;  %s789_s25 = int_to_ptr.hbm [resolvable:$true] %s788_s25 }
  0xd7   : > { %s790_s23 = scalar_lea.hbm %s789_s25, 2  ;;  %p793_p4 = scmp.lt.s32.totalorder %s789_s25, %s1125_s1 }
  0xd8   : > { %p791_p3 = scmp.ne.s32.totalorder %s789_s25, %s790_s23  ;;  %p794_p5 = scmp.lt.s32.totalorder %s962_s2, %s790_s23 }
  0xda   : > { %p795_p6 = por %p794_p5, %p793_p4 }
  0xdc   : > { %p796_p7 = pnand %p795_p6, %p791_p3 }
  0xde   : > { %799 = shalt.err (!%p796_p7)  }
  0xdf   : > { %273 = dma.vmem_to_hbm [thread:$0]  %s1029_s20, 32, %s269_s29, [#allocation2 + $0x3], %s860_s5, %s861_s6, %s862_s12 }
  0xe0   : > { %828 = dma.done.wait [#allocation2 + $0x4], 32 }
  0xe1   : > { %829 = vsyncadd [#allocation2 + $0x4], 4294967264 }
  0xe2   : > { %830 = dma.done.wait [#allocation2 + $0x5], 32 }
  0xe3   : > { %831 = vsyncadd [#allocation2 + $0x5], 4294967264 }
  0xe4   : > { %832 = dma.done.wait [#allocation2 + $0x6], 32 }
  0xe5   : > { %833 = vsyncadd [#allocation2 + $0x6], 4294967264 }
  0xe6   : > { %834 = dma.done.wait [#allocation2 + $0x7], 32 }
  0xe7   : > { %835 = vsyncadd [#allocation2 + $0x7], 4294967264 }
  0xe8   : > { %836 = dma.done.wait [#allocation2], 32 }
  0xe9   : > { %837 = vsyncadd [#allocation2], 4294967264 }
  0xea   : > { %838 = dma.done.wait [#allocation2 + $0x1], 32 }
  0xeb   : > { %839 = vsyncadd [#allocation2 + $0x1], 4294967264 }
  0xec   : > { %840 = dma.done.wait [#allocation2 + $0x2], 32 }
  0xed   : > { %841 = vsyncadd [#allocation2 + $0x2], 4294967264 }
  0xee   : > { %842 = dma.done.wait [#allocation2 + $0x3], 32 }
  0xef   : > { %843 = vsyncadd [#allocation2 + $0x3], 4294967264 }
  0xf0 PF: > { %p11_p8 = scmp.ge.s32.totalorder %s893_s11, 3   ;;  %s1131_s6 = smov %s850_s7 }
  0xf1   : > { %s1132_s7 = smov %s854_s8  ;;  %s1133_s8 = smov %s903_s14 }
  0xf2   : > { %s1134_s9 = smov %s893_s11  ;;  %13 = sbr.rel (!%p11_p8) target bundleno = 5 (0x5), region = 77 }
  0xf7   :  { %290 = vsyncpa [#allocation4], 1 }
  0xf8   :  { %292 = vsyncpa [#allocation4 + $0x1], 1 }
  0xf9   :  { %293 = vsyncmov [#allocation2] }
  0xfc   :  { %s294_s17 = vpop.sfrf %293 }
  0xfd   :  { %p431_p9 = scmp.ne.s32.totalorder %s294_s17, 0 }
  0xff   :  { %298 = shalt.err (%p431_p9)  }
 0x100   :  { %300 = vsyncmov [#allocation2 + $0x1] }
 0x103   :  { %s301_s2 = vpop.sfrf %300 }
 0x104   :  { %p432_p10 = scmp.ne.s32.totalorder %s301_s2, 0 }
 0x106   :  { %305 = shalt.err (%p432_p10)  }
 0x107   :  { %307 = vsyncmov [#allocation2 + $0x2] }
 0x10a   :  { %s308_s5 = vpop.sfrf %307 }
 0x10b   :  { %p433_p11 = scmp.ne.s32.totalorder %s308_s5, 0 }
 0x10d   :  { %312 = shalt.err (%p433_p11)  }
 0x10e   :  { %314 = vsyncmov [#allocation2 + $0x3] }
 0x111   :  { %s315_s12 = vpop.sfrf %314 }
 0x112   :  { %p434_p12 = scmp.ne.s32.totalorder %s315_s12, 0 }
 0x114   :  { %319 = shalt.err (%p434_p12)  }
 0x115   :  { %321 = vsyncmov [#allocation2 + $0x4] }
 0x118   :  { %s322_s11 = vpop.sfrf %321 }
 0x119   :  { %p435_p13 = scmp.ne.s32.totalorder %s322_s11, 0 }
 0x11b   :  { %326 = shalt.err (%p435_p13)  }
 0x11c   :  { %328 = vsyncmov [#allocation2 + $0x5] }
 0x11f   :  { %s329_s1 = vpop.sfrf %328 }
 0x120   :  { %p436_p0 = scmp.ne.s32.totalorder %s329_s1, 0 }
 0x122   :  { %333 = shalt.err (%p436_p0)  }
 0x123   :  { %335 = vsyncmov [#allocation2 + $0x6] }
 0x126   :  { %s336_s7 = vpop.sfrf %335 }
 0x127   :  { %p437_p1 = scmp.ne.s32.totalorder %s336_s7, 0 }
 0x129   :  { %340 = shalt.err (%p437_p1)  }
 0x12a   :  { %342 = vsyncmov [#allocation2 + $0x7] }
 0x12d   :  { %s343_s8 = vpop.sfrf %342 }
 0x12e   :  { %p438_p2 = scmp.ne.s32.totalorder %s343_s8, 0 }
 0x130   :  { %347 = shalt.err (%p438_p2)  }

</bundles_post_ra>
